<compile_context>
chip_gen: v7x
topology: tpu7x:2x2x1
jax: 0.10.0
libtpu: 0.0.40
codegen_flags: <defaults>
</compile_context>

<pallas_src>
import functools

import jax
import jax.numpy as jnp
from jax.experimental import pallas as pl
from jax.experimental.pallas import tpu as pltpu

LANES = 128
TARGET_TILE_BYTES = 4 << 20   # ~4 MiB per input per grid step (per review)


def _round_up(v, m):
    return ((v + m - 1) // m) * m


def _num_tensorcores():
    """2 on v7x (2 TCs/chip), 1 on v5e/v6e; safe fallback of 2 (serial dup block)."""
    try:
        info = pltpu.get_tpu_info()
    except Exception:
        return 2
    for attr in ("num_cores", "tensorcore_count", "num_tensorcores", "core_count"):
        v = getattr(info, attr, None)
        try:
            v = int(v)
        except (TypeError, ValueError):
            continue
        if v >= 1:
            return max(1, min(v, 2))
    return 2


def _dice_partial_kernel(x_ref, t_ref, oxt_ref, osum_ref, *,
                         rows, tile_rows, acc_rows, blocks_per_core):
    """Accumulates per-lane partial sums of x*t and x+t into (acc_rows, 128) f32.

    Grid: (core, step). Output block index depends only on `core`, so each
    core's accumulators stay resident in VMEM across its `step` axis.
    Hot path (full interior block): no mask work at all.
    Cold path (last / clamped duplicate block): iota row mask -> zeros.
    """
    c = pl.program_id(0)
    j = pl.program_id(1)

    @pl.when(j == 0)
    def _init():
        oxt_ref[...] = jnp.zeros_like(oxt_ref)
        osum_ref[...] = jnp.zeros_like(osum_ref)

    # Global row offset this step was *intended* to cover.
    row0 = (c * blocks_per_core + j) * tile_rows
    g = tile_rows // acc_rows

    def accumulate(x, t):
        # Sublane-only reshape (no cross-lane movement); g independent slices
        # fold into acc_rows*128/1024 independent f32 add chains per quantity.
        oxt_ref[...] += (x * t).reshape(g, acc_rows, LANES).sum(axis=0)
        osum_ref[...] += (x + t).reshape(g, acc_rows, LANES).sum(axis=0)

    is_full = (row0 + tile_rows) <= rows

    @pl.when(is_full)
    def _hot():
        accumulate(x_ref[...].astype(jnp.float32),
                   t_ref[...].astype(jnp.float32))

    @pl.when(jnp.logical_not(is_full))
    def _cold():
        # Ragged final block or clamped (duplicate) block: mask invalid rows.
        local_row = jax.lax.broadcasted_iota(jnp.int32, (tile_rows, LANES), 0)
        valid = (row0 + local_row) < rows
        x = jnp.where(valid, x_ref[...].astype(jnp.float32), 0.0)
        t = jnp.where(valid, t_ref[...].astype(jnp.float32), 0.0)
        accumulate(x, t)


def _dice_partial_sums(x2, t2):
    """Pallas reduction over (rows, 128) views: returns (sum(x*t), sum(x)+sum(t))."""
    rows = x2.shape[0]
    x_item = jnp.dtype(x2.dtype).itemsize
    t_item = jnp.dtype(t2.dtype).itemsize
    itemsize = max(x_item, t_item)

    # Minimum sublane granularity for the native-dtype input blocks.
    min_sublane = 16 if (x2.dtype == jnp.bfloat16 or t2.dtype == jnp.bfloat16) else 8

    # Byte-sized tile: ~4 MiB per input per step; multiple of 64.
    max_tile_rows = max(TARGET_TILE_BYTES // (LANES * itemsize), 64)
    max_tile_rows -= max_tile_rows % 64

    acc_rows = 64 if rows >= 64 else min_sublane
    tile_rows = min(max_tile_rows, _round_up(rows, acc_rows))

    num_cores = _num_tensorcores()
    total_blocks = (rows + tile_rows - 1) // tile_rows
    blocks_per_core = (total_blocks + num_cores - 1) // num_cores
    last_block = total_blocks - 1

    def in_index_map(c, j):
        # Clamp so a DMA never starts fully out of bounds; clamped (duplicate)
        # blocks contribute nothing because the kernel masks them to zero.
        return (jnp.minimum(c * blocks_per_core + j, last_block), 0)

    kernel = functools.partial(
        _dice_partial_kernel,
        rows=rows, tile_rows=tile_rows, acc_rows=acc_rows,
        blocks_per_core=blocks_per_core)

    acc_shape = jax.ShapeDtypeStruct((num_cores, acc_rows, LANES), jnp.float32)
    out_block = pl.BlockSpec((None, acc_rows, LANES), lambda c, j: (c, 0, 0))

    # 2 pipeline buffers x (x tile + t tile) + accumulators/scratch slack.
    tile_bytes = tile_rows * LANES * (x_item + t_item)
    vmem_limit = int(2 * tile_bytes + (8 << 20))

    in_bytes = rows * LANES * (x_item + t_item)
    out_bytes = 2 * num_cores * acc_rows * LANES * 4
    cost = pl.CostEstimate(flops=4 * rows * LANES,
                           transcendentals=0,
                           bytes_accessed=in_bytes + out_bytes)

    sxt, ssum = pl.pallas_call(
        kernel,
        out_shape=(acc_shape, acc_shape),
        grid_spec=pltpu.PrefetchScalarGridSpec(
            num_scalar_prefetch=0,
            grid=(num_cores, blocks_per_core),
            in_specs=[
                pl.BlockSpec((tile_rows, LANES), in_index_map),
                pl.BlockSpec((tile_rows, LANES), in_index_map),
            ],
            out_specs=(out_block, out_block),
        ),
        compiler_params=pltpu.CompilerParams(
            dimension_semantics=("parallel", "arbitrary"),
            vmem_limit_bytes=vmem_limit,
        ),
        cost_estimate=cost,
    )(x2, t2)

    # Tiny final cross-lane/core reduction in plain JAX.
    return jnp.sum(sxt, dtype=jnp.float32), jnp.sum(ssum, dtype=jnp.float32)


def dice_loss_with_logits(inputs, targets, smooth=1.0):
    """Pallas TPU implementation of DiceLossWithLogits.forward (no sigmoid)."""
    x = jnp.ravel(inputs)
    t = jnp.ravel(targets)

    # Keep f32/bf16 native (the kernel casts to f32 in VMEM); anything else
    # (ints/bools/f16/fp8/f64) is cast up front to keep (8,128)-family tiling.
    if x.dtype not in (jnp.float32, jnp.bfloat16):
        x = x.astype(jnp.float32)
    if t.dtype not in (jnp.float32, jnp.bfloat16):
        t = t.astype(jnp.float32)

    n = x.shape[0]
    if n == 0:
        # (2*0 + s) / (0 + 0 + s) == 1  ->  loss == 0
        return jnp.float32(0.0)

    rem = n % LANES
    n_main = n - rem
    if rem:
        # TODO(synk): the <128-element tail is reduced in plain JAX; an
        # in-kernel lane mask on the final block could absorb it too.
        x_tail = x[n_main:].astype(jnp.float32)
        t_tail = t[n_main:].astype(jnp.float32)
        tail_xt = jnp.sum(x_tail * t_tail)
        tail_sum = jnp.sum(x_tail) + jnp.sum(t_tail)
    else:
        tail_xt = jnp.float32(0.0)
        tail_sum = jnp.float32(0.0)

    if n_main == 0:
        intersection = tail_xt
        denom = tail_sum
    else:
        rows = n_main // LANES
        x2 = x[:n_main].reshape(rows, LANES)
        t2 = t[:n_main].reshape(rows, LANES)
        sxt, ssum = _dice_partial_sums(x2, t2)
        intersection = sxt + tail_xt
        denom = ssum + tail_sum

    dice = (2.0 * intersection + smooth) / (denom + smooth)
    return (1.0 - dice).astype(jnp.float32)


if __name__ == "__main__":
    key = jax.random.PRNGKey(0)
    k1, k2 = jax.random.split(key)

    # NCHW example, consistent with a segmentation-logits use case.
    inputs = jax.random.normal(k1, (2, 4, 16, 16), dtype=jnp.float32)
    targets = (jax.random.uniform(k2, (2, 4, 16, 16)) > 0.5).astype(jnp.float32)

    loss = dice_loss_with_logits(inputs, targets, smooth=1.0)
    loss = jax.block_until_ready(loss)

    # Pure-JAX reference check (same math as the PyTorch module).
    xr = inputs.reshape(-1)
    tr = targets.reshape(-1)
    inter = jnp.sum(xr * tr)
    ref = 1.0 - (2.0 * inter + 1.0) / (jnp.sum(xr) + jnp.sum(tr) + 1.0)
    assert jnp.allclose(loss, ref, rtol=1e-4, atol=1e-5), (loss, ref)

    print("KERNEL_OK")
</pallas_src>

<mosaic_0001>
module attributes {stable_mosaic.version = 11 : i64} {
  func.func @_dice_partial_kernel(%arg0: i32, %arg1: i32, %arg2: memref<16x128xf32, #tpu.memory_space<vmem>>, %arg3: memref<16x128xf32, #tpu.memory_space<vmem>>, %arg4: memref<1x8x128xf32, #tpu.memory_space<vmem>>, %arg5: memref<1x8x128xf32, #tpu.memory_space<vmem>>) attributes {dimension_semantics = [#tpu.dimension_semantics<parallel>, #tpu.dimension_semantics<arbitrary>], iteration_bounds = array<i64: 2, 1>, scalar_prefetch = 0 : i64, scratch_operands = 0 : i64, tpu.core_type = #tpu.core_type<tc>, window_params = [{transform_indices = @transform_0, window_bounds = array<i64: 16, 128>}, {transform_indices = @transform_1, window_bounds = array<i64: 16, 128>}, {transform_indices = @transform_2, window_bounds = array<i64: 1, 8, 128>}, {transform_indices = @transform_3, window_bounds = array<i64: 1, 8, 128>}]} {
    %c0_i32 = arith.constant 0 : i32
    %0 = arith.cmpi eq, %arg1, %c0_i32 : i32
    %1 = arith.extui %0 : i1 to i32
    %c0_i32_0 = arith.constant 0 : i32
    %2 = arith.cmpi ne, %1, %c0_i32_0 : i32
    scf.if %2 {
      %cst = arith.constant 0.000000e+00 : f32
      %13 = vector.broadcast %cst : f32 to vector<8x128xf32>
      %c0 = arith.constant 0 : index
      %c0_5 = arith.constant 0 : index
      %c0_6 = arith.constant 0 : index
      %14 = vector.load %arg4[%c0, %c0_5, %c0_6] : memref<1x8x128xf32, #tpu.memory_space<vmem>>, vector<1x8x128xf32>
      %15 = vector.shape_cast %14 : vector<1x8x128xf32> to vector<8x128xf32>
      %16 = vector.shape_cast %13 : vector<8x128xf32> to vector<1x8x128xf32>
      tpu.vector_store %arg4[%c0, %c0_5, %c0_6], %16 {strides = array<i32>} : memref<1x8x128xf32, #tpu.memory_space<vmem>>, vector<1x8x128xf32>,
      %cst_7 = arith.constant 0.000000e+00 : f32
      %17 = vector.broadcast %cst_7 : f32 to vector<8x128xf32>
      %c0_8 = arith.constant 0 : index
      %c0_9 = arith.constant 0 : index
      %c0_10 = arith.constant 0 : index
      %18 = vector.load %arg5[%c0_8, %c0_9, %c0_10] : memref<1x8x128xf32, #tpu.memory_space<vmem>>, vector<1x8x128xf32>
      %19 = vector.shape_cast %18 : vector<1x8x128xf32> to vector<8x128xf32>
      %20 = vector.shape_cast %17 : vector<8x128xf32> to vector<1x8x128xf32>
      tpu.vector_store %arg5[%c0_8, %c0_9, %c0_10], %20 {strides = array<i32>} : memref<1x8x128xf32, #tpu.memory_space<vmem>>, vector<1x8x128xf32>,
    } else {
    }
    %c1_i32 = arith.constant 1 : i32
    %3 = arith.muli %arg0, %c1_i32 : i32
    %4 = arith.addi %3, %arg1 : i32
    %c16_i32 = arith.constant 16 : i32
    %5 = arith.muli %4, %c16_i32 : i32
    %c16_i32_1 = arith.constant 16 : i32
    %6 = arith.addi %5, %c16_i32_1 : i32
    %c16_i32_2 = arith.constant 16 : i32
    %7 = arith.cmpi sle, %6, %c16_i32_2 : i32
    %8 = arith.extui %7 : i1 to i32
    %c0_i32_3 = arith.constant 0 : i32
    %9 = arith.cmpi ne, %8, %c0_i32_3 : i32
    scf.if %9 {
      %c0 = arith.constant 0 : index
      %c0_5 = arith.constant 0 : index
      %13 = vector.load %arg2[%c0, %c0_5] : memref<16x128xf32, #tpu.memory_space<vmem>>, vector<16x128xf32>
      %c0_6 = arith.constant 0 : index
      %c0_7 = arith.constant 0 : index
      %14 = vector.load %arg3[%c0_6, %c0_7] : memref<16x128xf32, #tpu.memory_space<vmem>>, vector<16x128xf32>
      %c0_8 = arith.constant 0 : index
      %c0_9 = arith.constant 0 : index
      %c0_10 = arith.constant 0 : index
      %15 = vector.load %arg4[%c0_8, %c0_9, %c0_10] : memref<1x8x128xf32, #tpu.memory_space<vmem>>, vector<1x8x128xf32>
      %16 = vector.shape_cast %15 : vector<1x8x128xf32> to vector<8x128xf32>
      %17 = arith.mulf %13, %14 : vector<16x128xf32>
      %18 = vector.shape_cast %17 : vector<16x128xf32> to vector<2x8x128xf32>
      %cst = arith.constant dense<0.000000e+00> : vector<8x128xf32>
      %19 = vector.multi_reduction <add>, %18, %cst [0] : vector<2x8x128xf32> to vector<8x128xf32>
      %20 = arith.addf %16, %19 : vector<8x128xf32>
      %c0_11 = arith.constant 0 : index
      %c0_12 = arith.constant 0 : index
      %c0_13 = arith.constant 0 : index
      %21 = vector.load %arg4[%c0_11, %c0_12, %c0_13] : memref<1x8x128xf32, #tpu.memory_space<vmem>>, vector<1x8x128xf32>
      %22 = vector.shape_cast %21 : vector<1x8x128xf32> to vector<8x128xf32>
      %23 = vector.shape_cast %20 : vector<8x128xf32> to vector<1x8x128xf32>
      tpu.vector_store %arg4[%c0_11, %c0_12, %c0_13], %23 {strides = array<i32>} : memref<1x8x128xf32, #tpu.memory_space<vmem>>, vector<1x8x128xf32>,
      %c0_14 = arith.constant 0 : index
      %c0_15 = arith.constant 0 : index
      %c0_16 = arith.constant 0 : index
      %24 = vector.load %arg5[%c0_14, %c0_15, %c0_16] : memref<1x8x128xf32, #tpu.memory_space<vmem>>, vector<1x8x128xf32>
      %25 = vector.shape_cast %24 : vector<1x8x128xf32> to vector<8x128xf32>
      %26 = arith.addf %13, %14 : vector<16x128xf32>
      %27 = vector.shape_cast %26 : vector<16x128xf32> to vector<2x8x128xf32>
      %cst_17 = arith.constant dense<0.000000e+00> : vector<8x128xf32>
      %28 = vector.multi_reduction <add>, %27, %cst_17 [0] : vector<2x8x128xf32> to vector<8x128xf32>
      %29 = arith.addf %25, %28 : vector<8x128xf32>
      %c0_18 = arith.constant 0 : index
      %c0_19 = arith.constant 0 : index
      %c0_20 = arith.constant 0 : index
      %30 = vector.load %arg5[%c0_18, %c0_19, %c0_20] : memref<1x8x128xf32, #tpu.memory_space<vmem>>, vector<1x8x128xf32>
      %31 = vector.shape_cast %30 : vector<1x8x128xf32> to vector<8x128xf32>
      %32 = vector.shape_cast %29 : vector<8x128xf32> to vector<1x8x128xf32>
      tpu.vector_store %arg5[%c0_18, %c0_19, %c0_20], %32 {strides = array<i32>} : memref<1x8x128xf32, #tpu.memory_space<vmem>>, vector<1x8x128xf32>,
    } else {
    }
    %true = arith.constant true
    %10 = arith.xori %7, %true : i1
    %11 = arith.extui %10 : i1 to i32
    %c0_i32_4 = arith.constant 0 : i32
    %12 = arith.cmpi ne, %11, %c0_i32_4 : i32
    scf.if %12 {
      %13 = tpu.iota {dimensions = array<i32: 0>} : vector<16x128xi32>
      %14 = vector.broadcast %5 : i32 to vector<16x128xi32>
      %15 = arith.addi %14, %13 : vector<16x128xi32>
      %c16_i32_5 = arith.constant 16 : i32
      %16 = vector.broadcast %c16_i32_5 : i32 to vector<16x128xi32>
      %17 = arith.cmpi slt, %15, %16 : vector<16x128xi32>
      %c0 = arith.constant 0 : index
      %c0_6 = arith.constant 0 : index
      %18 = vector.load %arg2[%c0, %c0_6] : memref<16x128xf32, #tpu.memory_space<vmem>>, vector<16x128xf32>
      %cst = arith.constant 0.000000e+00 : f32
      %19 = vector.broadcast %cst : f32 to vector<16x128xf32>
      %20 = arith.select %17, %18, %19 : vector<16x128xi1>, vector<16x128xf32>
      %c0_7 = arith.constant 0 : index
      %c0_8 = arith.constant 0 : index
      %21 = vector.load %arg3[%c0_7, %c0_8] : memref<16x128xf32, #tpu.memory_space<vmem>>, vector<16x128xf32>
      %cst_9 = arith.constant 0.000000e+00 : f32
      %22 = vector.broadcast %cst_9 : f32 to vector<16x128xf32>
      %23 = arith.select %17, %21, %22 : vector<16x128xi1>, vector<16x128xf32>
      %c0_10 = arith.constant 0 : index
      %c0_11 = arith.constant 0 : index
      %c0_12 = arith.constant 0 : index
      %24 = vector.load %arg4[%c0_10, %c0_11, %c0_12] : memref<1x8x128xf32, #tpu.memory_space<vmem>>, vector<1x8x128xf32>
      %25 = vector.shape_cast %24 : vector<1x8x128xf32> to vector<8x128xf32>
      %26 = arith.mulf %20, %23 : vector<16x128xf32>
      %27 = vector.shape_cast %26 : vector<16x128xf32> to vector<2x8x128xf32>
      %cst_13 = arith.constant dense<0.000000e+00> : vector<8x128xf32>
      %28 = vector.multi_reduction <add>, %27, %cst_13 [0] : vector<2x8x128xf32> to vector<8x128xf32>
      %29 = arith.addf %25, %28 : vector<8x128xf32>
      %c0_14 = arith.constant 0 : index
      %c0_15 = arith.constant 0 : index
      %c0_16 = arith.constant 0 : index
      %30 = vector.load %arg4[%c0_14, %c0_15, %c0_16] : memref<1x8x128xf32, #tpu.memory_space<vmem>>, vector<1x8x128xf32>
      %31 = vector.shape_cast %30 : vector<1x8x128xf32> to vector<8x128xf32>
      %32 = vector.shape_cast %29 : vector<8x128xf32> to vector<1x8x128xf32>
      tpu.vector_store %arg4[%c0_14, %c0_15, %c0_16], %32 {strides = array<i32>} : memref<1x8x128xf32, #tpu.memory_space<vmem>>, vector<1x8x128xf32>,
      %c0_17 = arith.constant 0 : index
      %c0_18 = arith.constant 0 : index
      %c0_19 = arith.constant 0 : index
      %33 = vector.load %arg5[%c0_17, %c0_18, %c0_19] : memref<1x8x128xf32, #tpu.memory_space<vmem>>, vector<1x8x128xf32>
      %34 = vector.shape_cast %33 : vector<1x8x128xf32> to vector<8x128xf32>
      %35 = arith.addf %20, %23 : vector<16x128xf32>
      %36 = vector.shape_cast %35 : vector<16x128xf32> to vector<2x8x128xf32>
      %cst_20 = arith.constant dense<0.000000e+00> : vector<8x128xf32>
      %37 = vector.multi_reduction <add>, %36, %cst_20 [0] : vector<2x8x128xf32> to vector<8x128xf32>
      %38 = arith.addf %34, %37 : vector<8x128xf32>
      %c0_21 = arith.constant 0 : index
      %c0_22 = arith.constant 0 : index
      %c0_23 = arith.constant 0 : index
      %39 = vector.load %arg5[%c0_21, %c0_22, %c0_23] : memref<1x8x128xf32, #tpu.memory_space<vmem>>, vector<1x8x128xf32>
      %40 = vector.shape_cast %39 : vector<1x8x128xf32> to vector<8x128xf32>
      %41 = vector.shape_cast %38 : vector<8x128xf32> to vector<1x8x128xf32>
      tpu.vector_store %arg5[%c0_21, %c0_22, %c0_23], %41 {strides = array<i32>} : memref<1x8x128xf32, #tpu.memory_space<vmem>>, vector<1x8x128xf32>,
    } else {
    }
    return
  }
  func.func @transform_0(%arg0: i32, %arg1: i32) -> (i32, i32) {
    %c1_i32 = arith.constant 1 : i32
    %0 = arith.muli %arg0, %c1_i32 : i32
    %1 = arith.addi %0, %arg1 : i32
    %c0_i32 = arith.constant 0 : i32
    %2 = arith.minsi %1, %c0_i32 : i32
    %c0_i32_0 = arith.constant 0 : i32
    %c0_i32_1 = arith.constant 0 : i32
    return %2, %c0_i32_0 : i32, i32
  }
  func.func @transform_1(%arg0: i32, %arg1: i32) -> (i32, i32) {
    %c1_i32 = arith.constant 1 : i32
    %0 = arith.muli %arg0, %c1_i32 : i32
    %1 = arith.addi %0, %arg1 : i32
    %c0_i32 = arith.constant 0 : i32
    %2 = arith.minsi %1, %c0_i32 : i32
    %c0_i32_0 = arith.constant 0 : i32
    %c0_i32_1 = arith.constant 0 : i32
    return %2, %c0_i32_0 : i32, i32
  }
  func.func @transform_2(%arg0: i32, %arg1: i32) -> (i32, i32, i32) {
    %c0_i32 = arith.constant 0 : i32
    %c0_i32_0 = arith.constant 0 : i32
    %c0_i32_1 = arith.constant 0 : i32
    return %arg0, %c0_i32, %c0_i32_0 : i32, i32, i32
  }
  func.func @transform_3(%arg0: i32, %arg1: i32) -> (i32, i32, i32) {
    %c0_i32 = arith.constant 0 : i32
    %c0_i32_0 = arith.constant 0 : i32
    %c0_i32_1 = arith.constant 0 : i32
    return %arg0, %c0_i32, %c0_i32_0 : i32, i32, i32
  }
}

</mosaic_0001>

<bundles_post_ra>
// kernel: tpu_custom_call.1
= control target key start
LH: loop header
LB: loop body
LE: loop exit
PB: predicated region body
PF: predicated region fallthrough
CT: control target
= control target key end

     0   :  { %9 = vsyncpa [#allocation3], 0  ;;  %s1114_s0 = inlined_call_operand.hbm [shape: f32[16,128], index: 0, kind: input, shape index: {}]   ;;  %s1115_s1 = inlined_call_operand.hbm [shape: f32[16,128], index: 1, kind: input, shape index: {}]   ;;  %s1116_s2 = inlined_call_operand.hbm [shape: f32[2,8,128], index: 2, kind: output, shape index: {0}]   ;;  %s1117_s3 = inlined_call_operand.hbm [shape: f32[2,8,128], index: 3, kind: output, shape index: {1}]  }
   0x1   :  { %11 = vsyncpa [#allocation3 + $0x1], 0 }
   0x2   :  { %12 = vsyncpa [#allocation6], 0 }
   0x3   :  { %14 = vsyncpa [#allocation6 + $0x1], 0 }
   0x4   :  { %15 = vsyncpa [#allocation4], 0 }
   0x5   :  { %17 = vsyncpa [#allocation4 + $0x1], 0 }
   0x6   :  { %18 = vsyncpa [#allocation9], 0 }
   0x7   :  { %20 = vsyncpa [#allocation9 + $0x1], 0  ;;  %s857_s12 = smov 0   ;;  %s859_s13 = smov 0  }
   0x8   :  { %s861_s14 = smov 0   ;;  %s863_s15 = smov 0  }
   0x9   :  { %s865_s16 = smov 0   ;;  %s867_s17 = smov 0  }
   0xa   :  { %s869_s18 = smov 0   ;;  %s871_s19 = smov 0  }
   0xb LB: > { %s504_s20 = sadd.s32 4294967295, %s828_s19   ;;  %s505_s21 = sadd.s32 4294967294, %s828_s19   ;;  %s828_s19 = sphi %s871_s19, %s26_s19   ;;  %s824_s18 = sphi %s869_s18, %s1136_s18   ;;  %s820_s17 = sphi %s867_s17, %s1135_s17   ;;  %s816_s16 = sphi %s865_s16, %s1104_s16   ;;  %s812_s15 = sphi %s863_s15, %s1134_s15   ;;  %s808_s14 = sphi %s861_s14, %s1133_s14   ;;  %s804_s13 = sphi %s859_s13, %s1132_s13   ;;  %s800_s12 = sphi %s857_s12, %s1131_s12  }
   0xc   : > { %s38_s22 = sadd.s32 1, %s824_s18  ;;  %p797_p1 = scmp.ne.s32.totalorder %s816_s16, 0 }
   0xd   : > { %p40_p0 = scmp.ge.s32.totalorder %s38_s22, 2  ;;  %p59_p2 = scmp.eq.s32.totalorder %s828_s19, 0 }
   0xe   : > { %p64_p3 = scmp.ne.s32.totalorder %s816_s16, %s812_s15  ;;  %p65_p5 = scmp.eq.s32.totalorder %s504_s20, 0 }
   0xf   : > { %s1138_s22 = smov (%p40_p0, %s38_s22), 0  ;;  %p903_p4 = por %p797_p1, %p59_p2 }
  0x10   : > { %p907_p6 = por %p65_p5, %p64_p3  ;;  %s106_s25 = ssub.s32 %s824_s18, %s1138_s22 }
  0x11   : > { %p107_p7 = scmp.eq.s32.totalorder %s106_s25, 0  ;;  %s109_s26 = sadd.s32 1, %s808_s14 }
  0x12   : > { %s1121_s24 = scalar_select %p907_p6, 1, 0 }
  0x13   : > { %s915_s27 = scalar_select %p107_p7, %s808_s14, %s109_s26  }
  0x14   : > { %p119_p8 = scmp.ne.s32.totalorder %s808_s14, %s804_s13  ;;  %p120_p9 = scmp.eq.s32.totalorder %s504_s20, 1 }
  0x15   : > { %p125_p10 = scmp.ne.s32.totalorder %s804_s13, %s800_s12  ;;  %p126_p11 = scmp.eq.s32.totalorder %s505_s21, 1 }
  0x16   : > { %p921_p12 = por %p120_p9, %p119_p8  ;;  %p552_p1 = scmp.lt.s32.totalorder %s828_s19, 2 }
  0x17   : > { %p926_p0 = por %p126_p11, %p125_p10  ;;  %s830_s30 = smov [#allocation2]  }
  0x18   : > { %s1122_s28 = scalar_select %p921_p12, 1, 0 }
  0x19   : > { %s1123_s29 = scalar_select %p926_p0, 1, 0 }
  0x1a   : > { %s186_s4 = sshll.u32 %s830_s30, 4  ;;  %p933_p2 = pnand %p552_p1, %p903_p4  ;;  %s187_s4 = int_to_ptr.vmem [resolvable:$true] %s186_s4 }
  0x1b   : > { %s629_s8 = scalar_lea.hbm %s1114_s0, 256 }
  0x1c   : > { %p630_p3 = scmp.ne.s32.totalorder %s1114_s0, %s629_s8  ;;  %p631_p5 = pneg %p933_p2 }
  0x1d   : > { %p636_p8 = scmp.lt.u32.totalorder %s629_s8, %s629_s8  ;;  %p638_p9 = scmp.lt.u32.totalorder %s629_s8, %s1114_s0 }
  0x1e   : > { %p632_p7 = pnand %p631_p5, %p630_p3 }
  0x1f   : > { %p639_p10 = por %p638_p9, %p636_p8 }
  0x20   : > { %p633_p4 = pneg %p632_p7 }
  0x22   : > { %p640_p11 = pnand %p639_p10, %p633_p4 }
  0x24   : > { %643 = shalt.err (!%p640_p11)
}
  0x25   : > { %s644_s20 = scalar_lea.vmem %s187_s4, 256  ;;  %s651_s21 = scalar_lea.vmem %s187_s4, 512 }
  0x26   : > { %p645_p1 = scmp.ne.s32.totalorder %s187_s4, %s644_s20  ;;  %p652_p12 = scmp.lt.s32.totalorder %s187_s4, %s187_s4 }
  0x27   : > { %p653_p6 = scmp.lt.s32.totalorder %s651_s21, %s644_s20 }
  0x28   : > { %p647_p13 = pnand %p645_p1, %p631_p5 }
  0x29   : > { %p654_p3 = por %p653_p6, %p652_p12 }
  0x2a   : > { %p648_p0 = pneg %p647_p13 }
  0x2c   : > { %p655_p7 = pnand %p654_p3, %p648_p0 }
  0x2e   : > { %658 = shalt.err (!%p655_p7)
}
  0x2f   : > { %s831_s23 = smov 128   ;;  %s832_s25 = smov 8  }
  0x30   : > { %541 = dma.hbm_to_vmem [thread:$0]  (!%p933_p2), %s1114_s0, 256, %s187_s4, [#allocation3], %s831_s23, %s831_s23, %s832_s25  }
  0x31   : > { %p514_p13 = scmp.ge.s32.totalorder %s828_s19, 1  ;;  %p218_p4 = scmp.lt.s32.totalorder %s828_s19, 3 }
  0x32   : > { %s833_s7 = smov [#allocation5]   ;;  %s659_s11 = scalar_lea.hbm %s1115_s1, 256 }
  0x33   : > { %p964_p8 = pnand %p514_p13, %p218_p4  ;;  %s210_s8 = sshll.u32 %s833_s7, 4  ;;  %s211_s8 = int_to_ptr.vmem [resolvable:$true] %s210_s8 }
  0x34   : > { %p660_p6 = scmp.ne.s32.totalorder %s1115_s1, %s659_s11  ;;  %p666_p9 = scmp.lt.u32.totalorder %s659_s11, %s659_s11 }
  0x35   : > { %s1125_s6 = scalar_select %p964_p8, 1, 0 }
  0x36   : > { %p662_p12 = pnand %p660_p6, %p631_p5  ;;  %p668_p10 = scmp.lt.u32.totalorder %s659_s11, %s1115_s1 }
  0x38   : > { %p663_p0 = pneg %p662_p12  ;;  %p669_p11 = por %p668_p10, %p666_p9 }
  0x3a   : > { %p670_p1 = pnand %p669_p11, %p663_p0 }
  0x3c   : > { %673 = shalt.err (!%p670_p1)
}
  0x3d   : > { %s674_s26 = scalar_lea.vmem %s211_s8, 256  ;;  %s681_s30 = scalar_lea.vmem %s211_s8, 512 }
  0x3e   : > { %p675_p3 = scmp.ne.s32.totalorder %s211_s8, %s674_s26  ;;  %p682_p4 = scmp.lt.s32.totalorder %s211_s8, %s211_s8 }
  0x3f   : > { %p683_p8 = scmp.lt.s32.totalorder %s681_s30, %s674_s26 }
  0x40   : > { %p677_p7 = pnand %p675_p3, %p631_p5 }
  0x41   : > { %p684_p6 = por %p683_p8, %p682_p4 }
  0x42   : > { %p678_p13 = pneg %p677_p7 }
  0x44   : > { %p685_p12 = pnand %p684_p6, %p678_p13 }
  0x46   : > { %688 = shalt.err (!%p685_p12)
}
  0x47   : > { %544 = dma.hbm_to_vmem [thread:$0]  (!%p933_p2), %s1115_s1, 256, %s211_s8, [#allocation6], %s831_s23, %s831_s23, %s832_s25  }
  0x48   : > { %p1126_p0 = scmp.ne.s32.totalorder %s1125_s6, 0 }
  0x49   : > { %s224_s10 = sand.u32 (!%p1126_p0), 1, %s816_s16   ;;  %p1127_p5 = scmp.ne.s32.totalorder (!%p1126_p0), %s1121_s24, 0 }
  0x4a   : > { %222 = sbr.rel (%p1126_p0) target bundleno = 165 (0xa5), region = 28  ;;  %s515_s11 = sshll.u32 (!%p1126_p0), %s224_s10, 4 }
  0x4b   : > { %s225_s15 = scalar_lea.sflag (!%p1126_p0), [#allocation3], %s224_s10  ;;  %s994_s20 = scalar_lea.vmem (!%p1126_p0), [#allocation2], %s515_s11 }
  0x51   : > { %782 = dma.done.wait (%p1127_p5), %s225_s15, 256  }
  0x52   : > { %784 = vsyncadd (%p1127_p5), %s225_s15, 4294967040  ;;  %s234_s5 = scalar_lea.sflag [#allocation6], %s224_s10  ;;  %s1000_s4 = scalar_lea.vmem [#allocation5], %s515_s11 }
  0x53   : > { %786 = dma.done.wait (%p1127_p5), %s234_s5, 256  }
  0x54   : > { %788 = vsyncadd (%p1127_p5), %s234_s5, 4294967040  ;;  %s1007_s23 = sand.u32 1, %s804_s13   ;;  %s519_s25 = sshll.u32 %s820_s17, 4  ;;  %v834_v0 = vmov 0.0  }
  0x55   : > { %s517_s6 = sshll.u32 %s1007_s23, 3  ;;  %s286_s8 = sadd.s32 16, %s519_s25 }
  0x56   : > { %s1011_s21 = scalar_lea.vmem [#allocation7], %s517_s6  ;;  %s1014_s26 = scalar_lea.vmem [#allocation8], %s517_s6 }
  0x57   : > { %282 = vst [vmem:[%s1011_s21] sm:$0xff] %v834_v0  ;;  %283 = vst [vmem:[%s1014_s26] sm:$0xff] %v834_v0  ;;  %p520_p2 = scmp.gt.s32.totalorder %s286_s8, 16 }
  0x58   : > { %v291_v1 = vld [vmem:[%s994_s20] sm:$0xff] (!%p520_p2)  ;;  %v292_v2 = vld [vmem:[%s994_s20 + $0x8] sm:$0xff] (!%p520_p2) }
  0x59   : > { %290 = sbr.rel (%p520_p2) target bundleno = 98 (0x62), region = 44  ;;  %v293_v3 = vld [vmem:[%s1000_s4] sm:$0xff] (!%p520_p2)  ;;  %v294_v4 = vld [vmem:[%s1000_s4 + $0x8] sm:$0xff] (!%p520_p2) }
  0x5a   : > { %v296_v5 = vmul.f32 (!%p520_p2), %v293_v3, %v291_v1  ;;  %v302_v6 = vadd.f32 (!%p520_p2), %v293_v3, %v291_v1  ;;  %v297_v7 = vmul.f32 (!%p520_p2), %v294_v4, %v292_v2  ;;  %v303_v8 = vadd.f32 (!%p520_p2), %v294_v4, %v292_v2 }
  0x5c   : > { %v298_v11 = vadd.f32 (!%p520_p2), %v297_v7, %v296_v5  ;;  %v304_v12 = vadd.f32 (!%p520_p2), %v303_v8, %v302_v6 }
  0x5e   : > { %v295_v9 = vld [vmem:[%s1011_s21] sm:$0xff] (!%p520_p2)  ;;  %v301_v10 = vld [vmem:[%s1014_s26] sm:$0xff] (!%p520_p2) }
  0x5f   : > { %v299_v13 = vadd.f32 (!%p520_p2), %v298_v11, %v295_v9  ;;  %v305_v14 = vadd.f32 (!%p520_p2), %v304_v12, %v301_v10 }
  0x61   : > { %300 = vst [vmem:[%s1011_s21] sm:$0xff] %v299_v13  ;;  %306 = vst [vmem:[%s1014_s26] sm:$0xff] %v305_v14 }
  0x62 PF: > { %p521_p8 = scmp.le.s32.totalorder %s286_s8, 16 }
  0x63   : > { %v311_v15 = vlaneseq (!%p521_p8)  ;;  %v314_v16 = vstv (!%p521_p8), %s519_s25  ;;  %v319_v20 = vld [vmem:[%s994_s20] sm:$0xff] (!%p521_p8)  ;;  %v320_v23 = vld [vmem:[%s994_s20 + $0x8] sm:$0xff] (!%p521_p8) }
  0x64   : > { %310 = sbr.rel (%p521_p8) target bundleno = 116 (0x74), region = 48  ;;  %v323_v21 = vld [vmem:[%s1000_s4] sm:$0xff] (!%p521_p8)  ;;  %v324_v24 = vld [vmem:[%s1000_s4 + $0x8] sm:$0xff] (!%p521_p8) }
  0x65   : > { %v312_v17 = vshrl.u32 (!%p521_p8), %v311_v15, 7 }
  0x67   : > { %v313_v18 = vadd.s32 (!%p521_p8), 8, %v312_v17  ;;  %v315_v19 = vadd.s32 (!%p521_p8), %v314_v16, %v312_v17 }
  0x68   : > { %v327_v33 = vld [vmem:[%s1011_s21] sm:$0xff] (!%p521_p8)  ;;  %v333_v34 = vld [vmem:[%s1014_s26] sm:$0xff] (!%p521_p8) }
  0x69   : > { %v316_v22 = vadd.s32 (!%p521_p8), %v314_v16, %v313_v18  ;;  %vm317_vm0 = vcmp.lt.s32.totalorder (!%p521_p8), %v315_v19, 16 }
  0x6a   : > { %v321_v25 = vsel (!%p521_p8), %vm317_vm0, %v319_v20, 0.0  ;;  %v325_v26 = vsel (!%p521_p8), %vm317_vm0, %v323_v21, 0.0 }
  0x6b   : > { %vm318_vm1 = vcmp.lt.s32.totalorder %v316_v22, 16  ;;  %v328_v27 = vmul.f32 %v325_v26, %v321_v25  ;;  %v334_v28 = vadd.f32 %v325_v26, %v321_v25 }
  0x6c   : > { %v322_v29 = vsel %vm318_vm1, %v320_v23, 0.0  ;;  %v326_v30 = vsel %vm318_vm1, %v324_v24, 0.0 }
  0x6d   : > { %v329_v31 = vmul.f32 %v326_v30, %v322_v29  ;;  %v335_v32 = vadd.f32 %v326_v30, %v322_v29 }
  0x6f   : > { %v330_v35 = vadd.f32 %v329_v31, %v328_v27  ;;  %v336_v36 = vadd.f32 %v335_v32, %v334_v28 }
  0x71   : > { %v331_v37 = vadd.f32 %v330_v35, %v327_v33  ;;  %v337_v38 = vadd.f32 %v336_v36, %v333_v34 }
  0x73   : > { %332 = vst [vmem:[%s1011_s21] sm:$0xff] %v331_v37  ;;  %338 = vst [vmem:[%s1014_s26] sm:$0xff] %v337_v38 }
  0x74 PF: > { %s524_s24 = sshll.u32 %s820_s17, 7  ;;  %s358_s10 = sshll.u32 %s1011_s21, 4  ;;  %s359_s10 = int_to_ptr.vmem [resolvable:$true] %s358_s10 }
  0x75   : > { %s1039_s9 = scalar_lea.hbm %s1116_s2, %s524_s24  ;;  %s340_s11 = scalar_lea.sflag [#allocation4], %s1007_s23 }
  0x76   : > { %s689_s15 = scalar_lea.vmem %s359_s10, 128  ;;  %p1128_p10 = scmp.ne.s32.totalorder %s1122_s28, 0 }
  0x77   : > { %p690_p9 = scmp.ne.s32.totalorder %s359_s10, %s689_s15  ;;  %s835_s20 = smov [#allocation7]  }
  0x78   : > { %s693_s5 = sshll.u32 %s835_s20, 4  ;;  %s694_s5 = int_to_ptr.vmem [resolvable:$false] %s693_s5 }
  0x79   : > { %p691_p11 = pnand %p690_p9, %p1128_p10  ;;  %s695_s4 = scalar_lea.vmem %s694_s5, 256 }
  0x7a   : > { %p696_p3 = scmp.lt.s32.totalorder %s359_s10, %s694_s5  ;;  %p697_p7 = scmp.lt.s32.totalorder %s695_s4, %s689_s15 }
  0x7b   : > { %p692_p1 = pneg %p691_p11 }
  0x7c   : > { %p698_p13 = por %p697_p7, %p696_p3 }
  0x7e   : > { %p699_p4 = pnand %p698_p13, %p692_p1 }
  0x80   : > { %702 = shalt.err (!%p699_p4)
}
  0x81   : > { %s703_s25 = scalar_lea.hbm %s1039_s9, 128  ;;  %s707_s21 = scalar_lea.hbm %s1116_s2, 256 }
  0x82   : > { %p704_p6 = scmp.ne.s32.totalorder %s1039_s9, %s703_s25  ;;  %p708_p5 = scmp.lt.u32.totalorder %s1039_s9, %s1116_s2 }
  0x83   : > { %p709_p2 = scmp.lt.u32.totalorder %s707_s21, %s703_s25  ;;  %p711_p9 = scmp.lt.u32.totalorder %s703_s25, %s1039_s9 }
  0x84   : > { %p705_p12 = pnand %p704_p6, %p1128_p10 }
  0x85   : > { %p710_p8 = por %p709_p2, %p708_p5 }
  0x86   : > { %p706_p0 = pneg %p705_p12 }
  0x87   : > { %p712_p11 = por %p711_p9, %p710_p8 }
  0x89   : > { %p713_p1 = pnand %p712_p11, %p706_p0 }
  0x8b   : > { %716 = shalt.err (!%p713_p1)
}
  0x8c   : > { %534 = dma.vmem_to_hbm [thread:$0]  (%p1128_p10), %s359_s10, 128, %s1039_s9, %s340_s11  }
  0x8d   : > { %s1065_s5 = scalar_lea.hbm %s1117_s3, %s524_s24  ;;  %s371_s4 = sshll.u32 %s1014_s26, 4  ;;  %s372_s4 = int_to_ptr.vmem [resolvable:$true] %s371_s4 }
  0x8e   : > { %s345_s25 = scalar_lea.sflag [#allocation9], %s1007_s23  ;;  %s717_s6 = scalar_lea.vmem %s372_s4, 128 }
  0x8f   : > { %p718_p3 = scmp.ne.s32.totalorder %s372_s4, %s717_s6  ;;  %s836_s8 = smov [#allocation8]  }
  0x90   : > { %s721_s21 = sshll.u32 %s836_s8, 4  ;;  %s722_s21 = int_to_ptr.vmem [resolvable:$false] %s721_s21 }
  0x91   : > { %p719_p7 = pnand %p718_p3, %p1128_p10  ;;  %s723_s30 = scalar_lea.vmem %s722_s21, 256 }
  0x92   : > { %p724_p4 = scmp.lt.s32.totalorder %s372_s4, %s722_s21  ;;  %p725_p6 = scmp.lt.s32.totalorder %s723_s30, %s717_s6 }
  0x93   : > { %p720_p13 = pneg %p719_p7 }
  0x94   : > { %p726_p12 = por %p725_p6, %p724_p4 }
  0x96   : > { %p727_p0 = pnand %p726_p12, %p720_p13 }
  0x98   : > { %730 = shalt.err (!%p727_p0)
}
  0x99   : > { %s731_s17 = scalar_lea.hbm %s1065_s5, 128  ;;  %s735_s24 = scalar_lea.hbm %s1117_s3, 256 }
  0x9a   : > { %p732_p5 = scmp.ne.s32.totalorder %s1065_s5, %s731_s17  ;;  %p736_p9 = scmp.lt.u32.totalorder %s1065_s5, %s1117_s3 }
  0x9b   : > { %p737_p11 = scmp.lt.u32.totalorder %s735_s24, %s731_s17  ;;  %p739_p3 = scmp.lt.u32.totalorder %s731_s17, %s1065_s5 }
  0x9c   : > { %p733_p2 = pnand %p732_p5, %p1128_p10 }
  0x9d   : > { %p738_p1 = por %p737_p11, %p736_p9 }
  0x9e   : > { %p734_p8 = pneg %p733_p2 }
  0x9f   : > { %p740_p7 = por %p739_p3, %p738_p1 }
  0xa1   : > { %p741_p13 = pnand %p740_p7, %p734_p8 }
  0xa3   : > { %744 = shalt.err (!%p741_p13)
}
  0xa4   : > { %535 = dma.vmem_to_hbm [thread:$0]  (%p1128_p10), %s372_s4, 128, %s1065_s5, %s345_s25  }
  0xa5 PF: > { %s383_s11 = sand.u32 1, %s800_s12   ;;  %p1129_p4 = scmp.ne.s32.totalorder %s1123_s29, 0 }
  0xa6   : > { %p1130_p6 = scmp.ge.s32.totalorder %s828_s19, 2  ;;  %s384_s7 = scalar_lea.sflag [#allocation4], %s383_s11 }
  0xa8   : > { %p546_p12 = pnand %p1130_p6, %p1129_p4 }
  0xaa   : > { %790 = dma.done.wait (!%p546_p12), %s384_s7, 128  }
  0xab   : > { %792 = vsyncadd (!%p546_p12), %s384_s7, 4294967168  ;;  %s393_s15 = scalar_lea.sflag [#allocation9], %s383_s11 }
  0xac   : > { %794 = dma.done.wait (!%p546_p12), %s393_s15, 128  }
  0xad   : > { %796 = vsyncadd (!%p546_p12), %s393_s15, 4294967168  ;;  %s26_s19 = sadd.s32 1, %s828_s19   ;;  %s1131_s12 = smov %s804_s13 }
  0xae   : > { %p23_p0 = scmp.ge.s32.totalorder %s26_s19, 4   ;;  %s1132_s13 = smov %s808_s14 }
  0xaf   : > { %s1133_s14 = smov %s915_s27  ;;  %s1134_s15 = smov %s816_s16 }
  0xb0   : > { %s1104_s16 = smov 0   ;;  %s1135_s17 = smov %s824_s18 }
  0xb1   : > { %s1136_s18 = smov %s1138_s22  ;;  %25 = sbr.rel (!%p23_p0) target bundleno = 11 (0xb), region = 115 }
  0xb8   :  { %398 = vsyncpa [#allocation3], 1 }
  0xb9   :  { %400 = vsyncpa [#allocation3 + $0x1], 1 }
  0xba   :  { %401 = vsyncpa [#allocation6], 1 }
  0xbb   :  { %403 = vsyncpa [#allocation6 + $0x1], 1 }
  0xbc   :  { %404 = vsyncpa [#allocation4], 1 }
  0xbd   :  { %406 = vsyncpa [#allocation4 + $0x1], 1 }
  0xbe   :  { %407 = vsyncpa [#allocation9], 1 }
  0xbf   :  { %409 = vsyncpa [#allocation9 + $0x1], 1 }

</bundles_post_ra>
